<compile_context>
chip_gen: v7x
topology: tpu7x:2x2x1
jax: 0.10.0
libtpu: 0.0.40
codegen_flags: <defaults>
</compile_context>

<pallas_src>
import math

import jax
import jax.numpy as jnp
from jax.experimental import pallas as pl
from jax.experimental.pallas import tpu as pltpu


# Padded, double-buffered block bytes targeted per grid step (x + out + pe).
_SEQ_TILE_VMEM_BUDGET = 24 << 20
# Scoped VMEM limit: <= 64 MiB (v7x physical), > 16 MiB (v5e default scoped),
# leaves ~2x headroom over the block budget above.
_VMEM_LIMIT_BYTES = 48 << 20


def _pos_enc_kernel(x_ref, pe_ref, out_ref):
    """x_ref: (TS, B, D), pe_ref: (TS, 1, D) -> out_ref: (TS, B, D).

    pe broadcasts over the batch (sublane) axis inside the kernel.
    """
    # TODO(synk): training-mode dropout (pltpu.prng_seed + prng_random_bits
    # keep-mask and 1/(1-p) rescale) is not reproduced; eval-mode dropout
    # (identity) is applied instead.
    out_ref[...] = x_ref[...] + pe_ref[...]


def make_pe_buffer(d_model, max_len=5000, dtype=jnp.float32):
    """Builds the same sinusoidal buffer PyTorch registers at __init__ ((L,1,D)).

    Build it in the model's compute dtype so no per-call cast is needed.
    """
    if d_model <= 0:
        raise ValueError("d_model must be positive for PositionalEncoding")
    position = jnp.arange(max_len, dtype=jnp.float32)[:, None]                # (L, 1)
    div_term = jnp.exp(jnp.arange(0, d_model, 2, dtype=jnp.float32)
                       * (-math.log(10000.0) / d_model))                      # (ceil(D/2),)
    pe = jnp.zeros((max_len, d_model), jnp.float32)
    pe = pe.at[:, 0::2].set(jnp.sin(position * div_term))
    if d_model > 1:
        pe = pe.at[:, 1::2].set(jnp.cos(position * div_term[: d_model // 2]))
    return pe[:, None, :].astype(dtype)                                       # (L, 1, D)


def _pick_seq_tile(S, B, D, dtype):
    """Largest seq tile that (a) fits the padded-VMEM budget, (b) leaves >=2
    grid steps for v7x megacore sharding, (c) does not exceed S."""
    itemsize = jnp.dtype(dtype).itemsize
    packing = max(1, 4 // max(1, itemsize))      # sub-32-bit dtypes pack in sublanes
    sublane = 8 * packing                        # 8 (f32), 16 (bf16), 32 (int8/fp8)

    b_pad = pl.cdiv(B, sublane) * sublane        # x/out blocks: B pads to sublane tile
    pe_pad = sublane                             # pe block: size-1 batch pads to 1 tile
    d_pad = pl.cdiv(D, 128) * 128                # lane padding (D=128 -> none)

    # Padded VMEM bytes per seq row: x + out (b_pad each) + pe, double-buffered.
    per_row = (2 * b_pad + pe_pad) * d_pad * itemsize * 2
    tile = max(8, _SEQ_TILE_VMEM_BUDGET // per_row)

    # At least two grid steps so both v7x TensorCores get work.
    half = max(8, pl.cdiv(pl.cdiv(S, 2), 8) * 8)
    tile = min(tile, half, S)
    if tile > 8:
        tile -= tile % 8                          # keep DMA rows sublane-aligned
    return max(1, tile)


def positional_encoding(x, pe_buffer, *, seq_tile=None):
    """x: (seq_len, batch, d_model); pe_buffer: (max_len, 1, d_model)."""
    S, B, D = x.shape
    max_len = pe_buffer.shape[0]
    if S > max_len:
        raise ValueError(
            f"Input sequence length {S} exceeds max_len {max_len} of PositionalEncoding")
    if D != pe_buffer.shape[2]:
        raise ValueError(
            f"Input embedding dimension {D} does not match PositionalEncoding "
            f"dimension {pe_buffer.shape[2]}")

    # No per-call cast when the buffer is already stored in the compute dtype;
    # otherwise cast only the rows actually consumed, not all max_len rows.
    pe = pe_buffer if pe_buffer.dtype == x.dtype else pe_buffer[:S].astype(x.dtype)

    if seq_tile is None:
        seq_tile = _pick_seq_tile(S, B, D, x.dtype)
    seq_tile = min(seq_tile, S)
    grid = (pl.cdiv(S, seq_tile),)

    return pl.pallas_call(
        _pos_enc_kernel,
        out_shape=jax.ShapeDtypeStruct((S, B, D), x.dtype),
        grid=grid,
        in_specs=[
            pl.BlockSpec((seq_tile, B, D), lambda i: (i, 0, 0)),   # x tile
            pl.BlockSpec((seq_tile, 1, D), lambda i: (i, 0, 0)),   # pe tile (unbroadcast)
        ],
        out_specs=pl.BlockSpec((seq_tile, B, D), lambda i: (i, 0, 0)),
        compiler_params=pltpu.CompilerParams(
            dimension_semantics=("parallel",),
            vmem_limit_bytes=_VMEM_LIMIT_BYTES,
        ),
    )(x, pe)


if __name__ == "__main__":
    # Small shapes consistent with the module's forward: (seq_len, batch, d_model).
    # d_model=128 keeps the lane dimension dense (full 128-lane vregs).
    SEQ, BATCH, D_MODEL = 16, 4, 128

    key = jax.random.PRNGKey(0)
    x = jax.random.normal(key, (SEQ, BATCH, D_MODEL), jnp.float32)

    # Buffer built once at init, in the compute dtype (no per-call cast).
    pe_buffer = make_pe_buffer(D_MODEL, max_len=5000, dtype=x.dtype)

    out = positional_encoding(x, pe_buffer)
    out = jax.block_until_ready(out)

    # Pure-JAX reference (eval-mode dropout == identity).
    ref = x + pe_buffer[:SEQ].astype(jnp.float32)

    assert out.shape == (SEQ, BATCH, D_MODEL)
    assert jnp.max(jnp.abs(out - ref)) < 1e-6, "mismatch vs JAX reference"

    print("KERNEL_OK")
</pallas_src>

<mosaic_0001>
module attributes {stable_mosaic.version = 11 : i64} {
  func.func @_pos_enc_kernel(%arg0: i32, %arg1: memref<8x4x128xf32, #tpu.memory_space<vmem>>, %arg2: memref<8x1x128xf32, #tpu.memory_space<vmem>>, %arg3: memref<8x4x128xf32, #tpu.memory_space<vmem>>) attributes {dimension_semantics = [#tpu.dimension_semantics<parallel>], iteration_bounds = array<i64: 2>, scalar_prefetch = 0 : i64, scratch_operands = 0 : i64, tpu.core_type = #tpu.core_type<tc>, window_params = [{transform_indices = @transform_0, window_bounds = array<i64: 8, 4, 128>}, {transform_indices = @transform_1, window_bounds = array<i64: 8, 1, 128>}, {transform_indices = @transform_2, window_bounds = array<i64: 8, 4, 128>}]} {
    %c0 = arith.constant 0 : index
    %c0_0 = arith.constant 0 : index
    %c0_1 = arith.constant 0 : index
    %0 = vector.load %arg1[%c0, %c0_0, %c0_1] : memref<8x4x128xf32, #tpu.memory_space<vmem>>, vector<8x4x128xf32>
    %c0_2 = arith.constant 0 : index
    %c0_3 = arith.constant 0 : index
    %c0_4 = arith.constant 0 : index
    %1 = vector.load %arg2[%c0_2, %c0_3, %c0_4] : memref<8x1x128xf32, #tpu.memory_space<vmem>>, vector<8x1x128xf32>
    %2 = vector.broadcast %1 : vector<8x1x128xf32> to vector<8x4x128xf32>
    %3 = arith.addf %0, %2 : vector<8x4x128xf32>
    %c0_5 = arith.constant 0 : index
    %c0_6 = arith.constant 0 : index
    %c0_7 = arith.constant 0 : index
    %4 = vector.load %arg3[%c0_5, %c0_6, %c0_7] : memref<8x4x128xf32, #tpu.memory_space<vmem>>, vector<8x4x128xf32>
    tpu.vector_store %arg3[%c0_5, %c0_6, %c0_7], %3 {strides = array<i32>} : memref<8x4x128xf32, #tpu.memory_space<vmem>>, vector<8x4x128xf32>,
    return
  }
  func.func @transform_0(%arg0: i32) -> (i32, i32, i32) {
    %c0_i32 = arith.constant 0 : i32
    %c0_i32_0 = arith.constant 0 : i32
    %c0_i32_1 = arith.constant 0 : i32
    return %arg0, %c0_i32, %c0_i32_0 : i32, i32, i32
  }
  func.func @transform_1(%arg0: i32) -> (i32, i32, i32) {
    %c0_i32 = arith.constant 0 : i32
    %c0_i32_0 = arith.constant 0 : i32
    %c0_i32_1 = arith.constant 0 : i32
    return %arg0, %c0_i32, %c0_i32_0 : i32, i32, i32
  }
  func.func @transform_2(%arg0: i32) -> (i32, i32, i32) {
    %c0_i32 = arith.constant 0 : i32
    %c0_i32_0 = arith.constant 0 : i32
    %c0_i32_1 = arith.constant 0 : i32
    return %arg0, %c0_i32, %c0_i32_0 : i32, i32, i32
  }
}

</mosaic_0001>

<bundles_post_ra>
// kernel: tpu_custom_call.1
= control target key start
LH: loop header
LB: loop body
LE: loop exit
PB: predicated region body
PF: predicated region fallthrough
CT: control target
= control target key end

     0   :  { %7 = vsyncpa [#allocation3], 0  ;;  %s882_s0 = inlined_call_operand.hbm [shape: f32[16,4,128], index: 0, kind: input, shape index: {}]   ;;  %s883_s1 = inlined_call_operand.hbm [shape: f32[5000,1,128], index: 1, kind: input, shape index: {}]   ;;  %s884_s2 = inlined_call_operand.hbm [shape: f32[16,4,128], index: 2, kind: output, shape index: {}]  }
   0x1   :  { %9 = vsyncpa [#allocation3 + $0x1], 0 }
   0x2   :  { %10 = vsyncpa [#allocation6], 0 }
   0x3   :  { %12 = vsyncpa [#allocation6 + $0x1], 0 }
   0x4   :  { %13 = vsyncpa [#allocation4], 0 }
   0x5   :  { %15 = vsyncpa [#allocation4 + $0x1], 0  ;;  %s637_s9 = smov 0   ;;  %s639_s10 = smov 0  }
   0x6   :  { %s641_s11 = smov 0   ;;  %s643_s12 = smov 0  }
   0x7 LB: > { %s658_s13 = sadd.s32 4294967295, %s611_s12   ;;  %s395_s14 = sadd.s32 4294967294, %s611_s12   ;;  %s611_s12 = sphi %s643_s12, %s900_s12   ;;  %s607_s11 = sphi %s641_s11, %s899_s11   ;;  %s603_s10 = sphi %s639_s10, %s898_s10   ;;  %s599_s9 = sphi %s637_s9, %s897_s9  }
   0x8   : > { %s662_s15 = sadd.s32 1, %s611_s12   ;;  %s28_s16 = sadd.s32 1, %s607_s11 }
   0x9   : > { %s25_s17 = ssub.s32 %s611_s12, %s662_s15  ;;  %p35_p0 = scmp.ne.s32.totalorder %s607_s11, %s603_s10 }
   0xa   : > { %p26_p1 = scmp.eq.s32.totalorder %s25_s17, 0  ;;  %p36_p2 = scmp.eq.s32.totalorder %s611_s12, 0 }
   0xb   : > { %p41_p3 = scmp.ne.s32.totalorder %s603_s10, %s599_s9  ;;  %p42_p4 = scmp.eq.s32.totalorder %s658_s13, 0 }
   0xc   : > { %s674_s18 = scalar_select %p26_p1, %s607_s11, %s28_s16  }
   0xd   : > { %p676_p5 = por %p36_p2, %p35_p0  ;;  %p680_p6 = por %p42_p4, %p41_p3 }
   0xe   : > { %p91_p7 = scmp.eq.s32.totalorder %s658_s13, 1  ;;  %p97_p8 = scmp.eq.s32.totalorder %s395_s14, 1 }
   0xf   : > { %s888_s20 = scalar_select %p680_p6, 1, 0 }
  0x10   : > { %p441_p10 = scmp.lt.s32.totalorder %s611_s12, 2  ;;  %p687_p11 = por %p91_p7, %p35_p0 }
  0x11   : > { %p691_p12 = por %p97_p8, %p41_p3  ;;  %s696_s23 = sand.u32 1, %s607_s11  }
  0x12   : > { %s889_s21 = scalar_select %p687_p11, 1, 0 }
  0x13   : > { %s890_s22 = scalar_select %p691_p12, 1, 0 }
  0x14   : > { %s421_s24 = sshll.u32 %s611_s12, 9  ;;  %s398_s25 = sshll.u32 %s696_s23, 5 }
  0x15   : > { %s703_s28 = scalar_lea.hbm %s882_s0, %s421_s24  ;;  %s121_s29 = scalar_lea.vmem [#allocation2], %s398_s25 }
  0x16   : > { %s128_s30 = sshll.u32 %s121_s29, 4  ;;  %p707_p13 = pnand %p441_p10, %p676_p5  ;;  %s711_s30 = int_to_ptr.vmem [resolvable:$true] %s128_s30 }
  0x17   : > { %s118_s4 = scalar_lea.sflag [#allocation3], %s696_s23  ;;  %s481_s5 = scalar_lea.hbm %s703_s28, 512 }
  0x18   : > { %p482_p0 = scmp.ne.s32.totalorder %s703_s28, %s481_s5  ;;  %p483_p1 = pneg %p707_p13 }
  0x19   : > { %s486_s8 = scalar_lea.hbm %s882_s0, 1024  ;;  %p487_p4 = scmp.lt.u32.totalorder %s703_s28, %s882_s0 }
  0x1a   : > { %p484_p2 = pnand %p483_p1, %p482_p0  ;;  %p488_p5 = scmp.lt.u32.totalorder %s486_s8, %s481_s5 }
  0x1b   : > { %p490_p8 = scmp.lt.u32.totalorder %s481_s5, %s703_s28 }
  0x1c   : > { %p485_p3 = pneg %p484_p2  ;;  %p489_p7 = por %p488_p5, %p487_p4 }
  0x1e   : > { %p491_p10 = por %p490_p8, %p489_p7 }
  0x20   : > { %p492_p9 = pnand %p491_p10, %p485_p3 }
  0x22   : > { %495 = shalt.err (!%p492_p9)
}
  0x23   : > { %s496_s17 = scalar_lea.vmem %s711_s30, 512  ;;  %s613_s19 = smov [#allocation2]  }
  0x24   : > { %p497_p0 = scmp.ne.s32.totalorder %s711_s30, %s496_s17  ;;  %s501_s24 = sshll.u32 %s613_s19, 4  ;;  %s502_s24 = int_to_ptr.vmem [resolvable:$false] %s501_s24 }
  0x25   : > { %s503_s25 = scalar_lea.vmem %s502_s24, 1024  ;;  %p504_p11 = scmp.lt.s32.totalorder %s711_s30, %s502_s24 }
  0x26   : > { %p499_p2 = pnand %p497_p0, %p483_p1  ;;  %p505_p4 = scmp.lt.s32.totalorder %s503_s25, %s496_s17 }
  0x28   : > { %p500_p12 = pneg %p499_p2  ;;  %p506_p5 = por %p505_p4, %p504_p11 }
  0x2a   : > { %p507_p7 = pnand %p506_p5, %p500_p12 }
  0x2c   : > { %510 = shalt.err (!%p507_p7)
}
  0x2d   : > { %s614_s26 = smov 64   ;;  %s615_s27 = smov 4  }
  0x2e   : > { %433 = dma.hbm_to_vmem [thread:$0]  (!%p707_p13), %s703_s28, 512, %s711_s30, %s118_s4, %s614_s26, %s614_s26, %s615_s27  }
  0x2f   : > { %p404_p9 = scmp.ge.s32.totalorder %s611_s12, 1  ;;  %p157_p3 = scmp.lt.s32.totalorder %s611_s12, 3 }
  0x30   : > { %s401_s29 = sshll.u32 %s696_s23, 3  ;;  %s422_s6 = sshll.u32 %s611_s12, 7 }
  0x31   : > { %p744_p11 = pnand %p404_p9, %p157_p3  ;;  %s142_s7 = scalar_lea.vmem [#allocation5], %s401_s29 }
  0x32   : > { %s149_s8 = sshll.u32 %s142_s7, 4  ;;  %s752_s17 = scalar_lea.hbm %s883_s1, %s422_s6  ;;  %s754_s8 = int_to_ptr.vmem [resolvable:$true] %s149_s8 }
  0x33   : > { %s139_s28 = scalar_lea.sflag [#allocation6], %s696_s23  ;;  %s511_s30 = scalar_lea.hbm %s752_s17, 128 }
  0x34   : > { %p512_p12 = scmp.ne.s32.totalorder %s752_s17, %s511_s30  ;;  %s516_s24 = scalar_lea.hbm %s883_s1, 80000 }
  0x35   : > { %p517_p0 = scmp.lt.u32.totalorder %s752_s17, %s883_s1  ;;  %p518_p2 = scmp.lt.u32.totalorder %s516_s24, %s511_s30 }
  0x36   : > { %p514_p8 = pnand %p512_p12, %p483_p1  ;;  %p520_p5 = scmp.lt.u32.totalorder %s511_s30, %s752_s17 }
  0x37   : > { %p519_p4 = por %p518_p2, %p517_p0 }
  0x38   : > { %p515_p10 = pneg %p514_p8 }
  0x39   : > { %p521_p7 = por %p520_p5, %p519_p4 }
  0x3b   : > { %p522_p9 = pnand %p521_p7, %p515_p10 }
  0x3d   : > { %525 = shalt.err (!%p522_p9)
}
  0x3e   : > { %s526_s27 = scalar_lea.vmem %s754_s8, 128  ;;  %s616_s29 = smov [#allocation5]  }
  0x3f   : > { %p527_p3 = scmp.ne.s32.totalorder %s754_s8, %s526_s27  ;;  %s531_s6 = sshll.u32 %s616_s29, 4  ;;  %s532_s6 = int_to_ptr.vmem [resolvable:$false] %s531_s6 }
  0x40   : > { %s533_s7 = scalar_lea.vmem %s532_s6, 256  ;;  %p534_p6 = scmp.lt.s32.totalorder %s754_s8, %s532_s6 }
  0x41   : > { %p529_p12 = pnand %p527_p3, %p483_p1  ;;  %p535_p0 = scmp.lt.s32.totalorder %s533_s7, %s526_s27 }
  0x43   : > { %p530_p8 = pneg %p529_p12  ;;  %p536_p2 = por %p535_p0, %p534_p6 }
  0x45   : > { %p537_p4 = pnand %p536_p2, %p530_p8 }
  0x47   : > { %540 = shalt.err (!%p537_p4)
}
  0x48   : > { %s617_s14 = smov 16   ;;  %s618_s16 = smov 1  }
  0x49   : > { %436 = dma.hbm_to_vmem [thread:$0]  (!%p707_p13), %s752_s17, 128, %s754_s8, %s139_s28, %s617_s14, %s617_s14, %s618_s16  }
  0x4a   : > { %161 = sbr.rel (%p744_p11) target bundleno = 117 (0x75), region = 28  ;;  %s785_s30 = sand.u32 (!%p744_p11), 1, %s603_s10  }
  0x4b   : > { %s405_s4 = sshll.u32 (!%p744_p11), %s785_s30, 5  ;;  %s164_s19 = scalar_lea.sflag (!%p744_p11), [#allocation3], %s785_s30 }
  0x4c   : > { %s789_s24 = scalar_lea.vmem (!%p744_p11), [#allocation2], %s405_s4  ;;  %p893_p6 = scmp.ne.s32.totalorder (!%p744_p11), %s888_s20, 0 }
  0x51   : > { %586 = dma.done.wait (%p893_p6), %s164_s19, 512  }
  0x52   : > { %588 = vsyncadd (%p893_p6), %s164_s19, 4294966784  ;;  %s406_s23 = sshll.u32 %s785_s30, 3  ;;  %s173_s3 = scalar_lea.sflag [#allocation6], %s785_s30 }
  0x53   : > { %s797_s5 = scalar_lea.vmem [#allocation5], %s406_s23 }
  0x54   : > { %590 = dma.done.wait (%p893_p6), %s173_s3, 128  }
  0x55   : > { %592 = vsyncadd (%p893_p6), %s173_s3, 4294967168  ;;  %s803_s8 = scalar_lea.vmem [#allocation7], %s405_s4  ;;  %s423_s28 = sshll.u32 %s658_s13, 9  ;;  %v205_v0 = vld [vmem:[%s789_s24] sm:$0xf] }
  0x56   : > { %s299_s17 = sshll.u32 %s803_s8, 4  ;;  %v408_v1 = vld [vmem:[%s797_s5] ss:$0 sm:$0xff]  ;;  %v206_v2 = vld [vmem:[%s789_s24 + $0x4] sm:$0xf]  ;;  %s834_s26 = scalar_lea.hbm %s884_s2, %s423_s28  ;;  %s825_s17 = int_to_ptr.vmem [resolvable:$true] %s299_s17 }
  0x57   : > { %v269_v3 = vadd.f32 %v408_v1, %v205_v0  ;;  %v409_v4 = vld [vmem:[%s797_s5 + $0x1] ss:$0 sm:$0xff]  ;;  %v410_v6 = vld [vmem:[%s797_s5 + $0x2] ss:$0 sm:$0xff]  ;;  %v208_v9 = vld [vmem:[%s789_s24 + $0xc] sm:$0xf] }
  0x58   : > { %v207_v5 = vld [vmem:[%s789_s24 + $0x8] sm:$0xf]  ;;  %v270_v7 = vadd.f32 %v409_v4, %v206_v2  ;;  %v209_v11 = vld [vmem:[%s789_s24 + $0x10] sm:$0xf]  ;;  %v412_v13 = vld [vmem:[%s797_s5 + $0x4] ss:$0 sm:$0xff] }
  0x59   : > { %v271_v8 = vadd.f32 %v410_v6, %v207_v5  ;;  %v411_v10 = vld [vmem:[%s797_s5 + $0x3] ss:$0 sm:$0xff]  ;;  %277 = vst [vmem:[%s803_s8] sm:$0xf] %v269_v3  ;;  %v210_v14 = vld [vmem:[%s789_s24 + $0x14] sm:$0xf]  ;;  %v273_v16 = vadd.f32 %v412_v13, %v209_v11  ;;  %s286_s27 = scalar_lea.sflag [#allocation4], %s785_s30 }
  0x5a   : > { %v272_v12 = vadd.f32 %v411_v10, %v208_v9  ;;  %v413_v15 = vld [vmem:[%s797_s5 + $0x5] ss:$0 sm:$0xff]  ;;  %278 = vst [vmem:[%s803_s8 + $0x4] sm:$0xf] %v270_v7  ;;  %v211_v18 = vld [vmem:[%s789_s24 + $0x18] sm:$0xf] }
  0x5b   : > { %279 = vst [vmem:[%s803_s8 + $0x8] sm:$0xf] %v271_v8  ;;  %v274_v17 = vadd.f32 %v413_v15, %v210_v14  ;;  %v414_v19 = vld [vmem:[%s797_s5 + $0x6] ss:$0 sm:$0xff]  ;;  %v212_v20 = vld [vmem:[%s789_s24 + $0x1c] sm:$0xf] }
  0x5c   : > { %280 = vst [vmem:[%s803_s8 + $0xc] sm:$0xf] %v272_v12  ;;  %v275_v21 = vadd.f32 %v414_v19, %v211_v18  ;;  %v415_v22 = vld [vmem:[%s797_s5 + $0x7] ss:$0 sm:$0xff]  ;;  %281 = vst [vmem:[%s803_s8 + $0x10] sm:$0xf] %v273_v16 }
  0x5d   : > { %282 = vst [vmem:[%s803_s8 + $0x14] sm:$0xf] %v274_v17  ;;  %v276_v23 = vadd.f32 %v415_v22, %v212_v20  ;;  %s541_s29 = scalar_lea.vmem %s825_s17, 512  ;;  %p894_p1 = scmp.ne.s32.totalorder %s889_s21, 0 }
  0x5e   : > { %283 = vst [vmem:[%s803_s8 + $0x18] sm:$0xf] %v275_v21  ;;  %p542_p13 = scmp.ne.s32.totalorder %s825_s17, %s541_s29  ;;  %s619_s6 = smov [#allocation7]  }
  0x5f   : > { %284 = vst [vmem:[%s803_s8 + $0x1c] sm:$0xf] %v276_v23  ;;  %s545_s7 = sshll.u32 %s619_s6, 4  ;;  %s546_s7 = int_to_ptr.vmem [resolvable:$false] %s545_s7 }
  0x60   : > { %p543_p11 = pnand %p542_p13, %p894_p1  ;;  %s547_s13 = scalar_lea.vmem %s546_s7, 1024 }
  0x61   : > { %p548_p5 = scmp.lt.s32.totalorder %s825_s17, %s546_s7  ;;  %p549_p7 = scmp.lt.s32.totalorder %s547_s13, %s541_s29 }
  0x62   : > { %p544_p10 = pneg %p543_p11 }
  0x63   : > { %p550_p9 = por %p549_p7, %p548_p5 }
  0x65   : > { %p551_p3 = pnand %p550_p9, %p544_p10 }
  0x67   : > { %554 = shalt.err (!%p551_p3)
}
  0x68   : > { %s555_s14 = scalar_lea.hbm %s834_s26, 512  ;;  %s559_s19 = scalar_lea.hbm %s884_s2, 1024 }
  0x69   : > { %p556_p12 = scmp.ne.s32.totalorder %s834_s26, %s555_s14  ;;  %p560_p2 = scmp.lt.u32.totalorder %s834_s26, %s884_s2 }
  0x6a   : > { %p561_p4 = scmp.lt.u32.totalorder %s559_s19, %s555_s14  ;;  %p563_p13 = scmp.lt.u32.totalorder %s555_s14, %s834_s26 }
  0x6b   : > { %p557_p8 = pnand %p556_p12, %p894_p1 }
  0x6c   : > { %p562_p6 = por %p561_p4, %p560_p2 }
  0x6d   : > { %p558_p0 = pneg %p557_p8 }
  0x6e   : > { %p564_p11 = por %p563_p13, %p562_p6 }
  0x70   : > { %p565_p10 = pnand %p564_p11, %p558_p0 }
  0x72   : > { %568 = shalt.err (!%p565_p10)
}
  0x73   : > { %s620_s3 = smov 64   ;;  %s621_s5 = smov 4  }
  0x74   : > { %428 = dma.vmem_to_hbm [thread:$0]  (%p894_p1), %s825_s17, 512, %s834_s26, %s286_s27, %s620_s3, %s620_s3, %s621_s5  }
  0x75 PF: > { %s314_s8 = sand.u32 1, %s599_s9   ;;  %p895_p5 = scmp.ne.s32.totalorder %s890_s22, 0 }
  0x76   : > { %p896_p7 = scmp.ge.s32.totalorder %s611_s12, 2  ;;  %s315_s28 = scalar_lea.sflag [#allocation4], %s314_s8 }
  0x78   : > { %p438_p9 = pnand %p896_p7, %p895_p5 }
  0x7a   : > { %594 = dma.done.wait (!%p438_p9), %s315_s28, 512  }
  0x7b   : > { %596 = vsyncadd (!%p438_p9), %s315_s28, 4294966784  ;;  %p18_p3 = scmp.ge.s32.totalorder %s662_s15, 4   ;;  %s897_s9 = smov %s603_s10 }
  0x7c   : > { %s898_s10 = smov %s607_s11  ;;  %s899_s11 = smov %s674_s18 }
  0x7d   : > { %s900_s12 = smov %s662_s15  ;;  %20 = sbr.rel (!%p18_p3) target bundleno = 7 (0x7), region = 86 }
  0x84   :  { %320 = vsyncpa [#allocation3], 1 }
  0x85   :  { %322 = vsyncpa [#allocation3 + $0x1], 1 }
  0x86   :  { %323 = vsyncpa [#allocation6], 1 }
  0x87   :  { %325 = vsyncpa [#allocation6 + $0x1], 1 }
  0x88   :  { %326 = vsyncpa [#allocation4], 1 }
  0x89   :  { %328 = vsyncpa [#allocation4 + $0x1], 1 }

</bundles_post_ra>
